<compile_context>
chip_gen: v7x
topology: tpu7x:2x2x1
jax: 0.10.0
libtpu: 0.0.40
codegen_flags: <defaults>
</compile_context>

<pallas_src>
import math

import jax
import jax.numpy as jnp
from jax import lax
from jax.experimental import pallas as pl
from jax.experimental.pallas import tpu as pltpu

LANE = 128
SUBLANE = 8
NEG_BIG = -1e30  # finite "minus infinity" for masked softmax lanes


def _round_up(n, m):
    return ((n + m - 1) // m) * m


def mlp_softmax_kernel(x_ref, w1_ref, b1_ref, w2_ref, b2_ref, w3_ref, b3_ref,
                       mask_ref, o_ref):
    # layer 1: Linear + ReLU
    h = jnp.dot(x_ref[...], w1_ref[...], preferred_element_type=jnp.float32) + b1_ref[...]
    h = jnp.maximum(h, 0.0)
    # layer 2: Linear + ReLU
    h = jnp.dot(h, w2_ref[...], preferred_element_type=jnp.float32) + b2_ref[...]
    h = jnp.maximum(h, 0.0)
    # layer 3 (lane-padded to 128 cols): Linear + ReLU
    # (ReLU after the final Linear intentionally mirrors the PyTorch loop bound)
    h = jnp.dot(h, w3_ref[...], preferred_element_type=jnp.float32) + b3_ref[...]
    h = jnp.maximum(h, 0.0)
    # additive mask: 0 on real output lanes, -1e30 on padding lanes
    h = h + mask_ref[...]
    # softmax over the last dim (F.softmax on a 2-D input -> dim=1)
    m = jnp.max(h, axis=-1, keepdims=True)
    e = jnp.exp(h - m)
    s = jnp.sum(e, axis=-1, keepdims=True)
    o_ref[...] = (e / s).astype(o_ref.dtype)  # exact divide (correctness)


def net_forward(x, params, *, tile_b=None):
    """x: (B, input_size) f32; params: list of (W_t, b_row), W_t (in, out), b_row (1, out)."""
    assert len(params) == 3, "kernel is specialized for the 3-Linear-layer Net config"
    (w1, b1), (w2, b2), (w3, b3) = params
    in_size = w1.shape[0]
    h1, h2 = w1.shape[1], w2.shape[1]
    out_size = w3.shape[1]

    # ---- lane-dense output: pad final layer to a multiple of 128 columns ----
    out_pad = _round_up(out_size, LANE)
    w3p = jnp.pad(w3, ((0, 0), (0, out_pad - out_size)))
    b3p = jnp.pad(b3, ((0, 0), (0, out_pad - out_size)))
    mask = jnp.where(jnp.arange(out_pad) < out_size, 0.0, NEG_BIG)
    mask = mask.astype(jnp.float32).reshape(1, out_pad)

    # ---- batch tiling: big, sublane-aligned tiles (overhead/HBM-bound kernel) ----
    B = x.shape[0]
    if tile_b is None:
        tile_b = min(1024, _round_up(B, SUBLANE))
    tile_b = _round_up(tile_b, SUBLANE)
    B_pad = _round_up(B, tile_b)
    xp = jnp.pad(x, ((0, B_pad - B), (0, 0)))

    grid = (B_pad // tile_b,)
    operands = (xp, w1, b1, w2, b2, w3p, b3p, mask)

    in_specs = [pl.BlockSpec((tile_b, in_size), lambda b: (b, 0))]  # batch-tiled x
    # weights / biases / mask: full-array blocks, constant index_map -> VMEM-resident
    in_specs += [pl.BlockSpec(a.shape, lambda b: (0, 0)) for a in operands[1:]]
    out_spec = pl.BlockSpec((tile_b, out_pad), lambda b: (b, 0))

    # advisory cost estimate using *physical* (lane-padded) HBM byte counts
    flops = 2 * B_pad * (in_size * h1 + h1 * h2 + h2 * out_pad)
    transcendentals = B_pad * out_pad  # softmax exp
    bytes_accessed = 4 * (B_pad * LANE                      # x, lane-padded in HBM
                          + B_pad * out_pad                 # output
                          + w1.size + b1.size + w2.size + b2.size
                          + w3p.size + b3p.size + mask.size)

    out = pl.pallas_call(
        mlp_softmax_kernel,
        out_shape=jax.ShapeDtypeStruct((B_pad, out_pad), jnp.float32),
        grid_spec=pltpu.PrefetchScalarGridSpec(
            num_scalar_prefetch=0,
            grid=grid,
            in_specs=in_specs,
            out_specs=out_spec,
        ),
        compiler_params=pltpu.CompilerParams(
            dimension_semantics=("parallel",),  # batch axis; both TCs on v7x
        ),
        cost_estimate=pl.CostEstimate(
            flops=flops,
            transcendentals=transcendentals,
            bytes_accessed=bytes_accessed,
        ),
    )(*operands)

    # strip batch + lane padding
    return out[:B, :out_size]


def init_linear(key, fan_in, fan_out):
    """Deterministic init mimicking nn.Linear default: U(-1/sqrt(fan_in), 1/sqrt(fan_in))."""
    kw, kb = jax.random.split(key)
    bound = 1.0 / math.sqrt(fan_in)
    # stored already transposed: (in, out); bias as a (1, out) row for clean TPU layout
    w_t = jax.random.uniform(kw, (fan_in, fan_out), jnp.float32, -bound, bound)
    b = jax.random.uniform(kb, (1, fan_out), jnp.float32, -bound, bound)
    return w_t, b


def make_params(input_size, output_size, n_h_layers, h_size, key):
    # replicate the module's node_count construction
    node_count = [input_size]
    for _ in range(n_h_layers - 2):
        node_count.append(h_size)
    node_count.append(output_size)
    keys = jax.random.split(key, len(node_count) - 1)
    return [init_linear(keys[i], node_count[i], node_count[i + 1])
            for i in range(len(node_count) - 1)]


def reference_forward(x, params, n_layers):
    """Pure-JAX reference with identical semantics (full-precision matmuls)."""
    h = x
    for i, (w_t, b) in enumerate(params):
        h = jnp.dot(h, w_t, precision=lax.Precision.HIGHEST) + b
        if i != n_layers - 1:
            h = jnp.maximum(h, 0.0)
    return jax.nn.softmax(h, axis=1)


if __name__ == "__main__":
    input_size, output_size, n_h_layers, h_size = 16, 8, 4, 32
    n_layers = n_h_layers + 2

    key = jax.random.PRNGKey(0)
    kx, kx2, kp = jax.random.split(key, 3)
    params = make_params(input_size, output_size, n_h_layers, h_size, kp)

    # small batch: exercises batch padding inside a single (auto-sized) tile
    x_small = jax.random.normal(kx, (4, input_size), jnp.float32)
    out_small = jax.block_until_ready(net_forward(x_small, params))
    ref_small = reference_forward(x_small, params, n_layers)
    assert out_small.shape == (4, output_size)
    assert jnp.allclose(out_small, ref_small, atol=2e-3, rtol=2e-3), \
        "small-batch mismatch vs pure-JAX reference"
    assert jnp.allclose(jnp.sum(out_small, axis=-1), 1.0, atol=1e-3)

    # larger batch: exercises a multi-step grid with VMEM-resident weights
    x_big = jax.random.normal(kx2, (300, input_size), jnp.float32)
    out_big = jax.block_until_ready(net_forward(x_big, params, tile_b=128))
    ref_big = reference_forward(x_big, params, n_layers)
    assert out_big.shape == (300, output_size)
    assert jnp.allclose(out_big, ref_big, atol=2e-3, rtol=2e-3), \
        "large-batch mismatch vs pure-JAX reference"
    assert jnp.allclose(jnp.sum(out_big, axis=-1), 1.0, atol=1e-3)

    print("KERNEL_OK")
</pallas_src>

<mosaic_0001>
module attributes {stable_mosaic.version = 11 : i64} {
  func.func @mlp_softmax_kernel(%arg0: i32, %arg1: memref<8x16xf32, #tpu.memory_space<vmem>>, %arg2: memref<16x32xf32, #tpu.memory_space<vmem>>, %arg3: memref<1x32xf32, #tpu.memory_space<vmem>>, %arg4: memref<32x32xf32, #tpu.memory_space<vmem>>, %arg5: memref<1x32xf32, #tpu.memory_space<vmem>>, %arg6: memref<32x128xf32, #tpu.memory_space<vmem>>, %arg7: memref<1x128xf32, #tpu.memory_space<vmem>>, %arg8: memref<1x128xf32, #tpu.memory_space<vmem>>, %arg9: memref<8x128xf32, #tpu.memory_space<vmem>>) attributes {dimension_semantics = [#tpu.dimension_semantics<parallel>], iteration_bounds = array<i64: 1>, scalar_prefetch = 0 : i64, scratch_operands = 0 : i64, tpu.core_type = #tpu.core_type<tc>, window_params = [{transform_indices = @transform_0, window_bounds = array<i64: 8, 16>}, {pipeline_mode = #tpu.pipeline_mode<synchronous>, transform_indices = @transform_1, window_bounds = array<i64: 16, 32>}, {pipeline_mode = #tpu.pipeline_mode<synchronous>, transform_indices = @transform_2, window_bounds = array<i64: 1, 32>}, {pipeline_mode = #tpu.pipeline_mode<synchronous>, transform_indices = @transform_3, window_bounds = array<i64: 32, 32>}, {pipeline_mode = #tpu.pipeline_mode<synchronous>, transform_indices = @transform_4, window_bounds = array<i64: 1, 32>}, {pipeline_mode = #tpu.pipeline_mode<synchronous>, transform_indices = @transform_5, window_bounds = array<i64: 32, 128>}, {pipeline_mode = #tpu.pipeline_mode<synchronous>, transform_indices = @transform_6, window_bounds = array<i64: 1, 128>}, {pipeline_mode = #tpu.pipeline_mode<synchronous>, transform_indices = @transform_7, window_bounds = array<i64: 1, 128>}, {transform_indices = @transform_8, window_bounds = array<i64: 8, 128>}]} {
    %c0 = arith.constant 0 : index
    %c0_0 = arith.constant 0 : index
    %0 = vector.load %arg1[%c0, %c0_0] : memref<8x16xf32, #tpu.memory_space<vmem>>, vector<8x16xf32>
    %c0_1 = arith.constant 0 : index
    %c0_2 = arith.constant 0 : index
    %1 = vector.load %arg2[%c0_1, %c0_2] : memref<16x32xf32, #tpu.memory_space<vmem>>, vector<16x32xf32>
    %cst = arith.constant dense<0.000000e+00> : vector<8x32xf32>
    %2 = tpu.matmul %0, %1, %cst {dimension_numbers = #tpu.dot_dimension_numbers<[1], [0], [0], [1], [0, 0, 1, 1], [], []>} : vector<8x16xf32>, vector<16x32xf32>, vector<8x32xf32> -> vector<8x32xf32>
    %c0_3 = arith.constant 0 : index
    %c0_4 = arith.constant 0 : index
    %3 = vector.load %arg3[%c0_3, %c0_4] : memref<1x32xf32, #tpu.memory_space<vmem>>, vector<1x32xf32>
    %4 = vector.broadcast %3 : vector<1x32xf32> to vector<8x32xf32>
    %5 = arith.addf %2, %4 : vector<8x32xf32>
    %cst_5 = arith.constant 0.000000e+00 : f32
    %6 = vector.broadcast %cst_5 : f32 to vector<8x32xf32>
    %7 = arith.maximumf %5, %6 : vector<8x32xf32>
    %c0_6 = arith.constant 0 : index
    %c0_7 = arith.constant 0 : index
    %8 = vector.load %arg4[%c0_6, %c0_7] : memref<32x32xf32, #tpu.memory_space<vmem>>, vector<32x32xf32>
    %cst_8 = arith.constant dense<0.000000e+00> : vector<8x32xf32>
    %9 = tpu.matmul %7, %8, %cst_8 {dimension_numbers = #tpu.dot_dimension_numbers<[1], [0], [0], [1], [0, 0, 1, 1], [], []>} : vector<8x32xf32>, vector<32x32xf32>, vector<8x32xf32> -> vector<8x32xf32>
    %c0_9 = arith.constant 0 : index
    %c0_10 = arith.constant 0 : index
    %10 = vector.load %arg5[%c0_9, %c0_10] : memref<1x32xf32, #tpu.memory_space<vmem>>, vector<1x32xf32>
    %11 = vector.broadcast %10 : vector<1x32xf32> to vector<8x32xf32>
    %12 = arith.addf %9, %11 : vector<8x32xf32>
    %cst_11 = arith.constant 0.000000e+00 : f32
    %13 = vector.broadcast %cst_11 : f32 to vector<8x32xf32>
    %14 = arith.maximumf %12, %13 : vector<8x32xf32>
    %c0_12 = arith.constant 0 : index
    %c0_13 = arith.constant 0 : index
    %15 = vector.load %arg6[%c0_12, %c0_13] : memref<32x128xf32, #tpu.memory_space<vmem>>, vector<32x128xf32>
    %cst_14 = arith.constant dense<0.000000e+00> : vector<8x128xf32>
    %16 = tpu.matmul %14, %15, %cst_14 {dimension_numbers = #tpu.dot_dimension_numbers<[1], [0], [0], [1], [0, 0, 1, 1], [], []>} : vector<8x32xf32>, vector<32x128xf32>, vector<8x128xf32> -> vector<8x128xf32>
    %c0_15 = arith.constant 0 : index
    %c0_16 = arith.constant 0 : index
    %17 = vector.load %arg7[%c0_15, %c0_16] : memref<1x128xf32, #tpu.memory_space<vmem>>, vector<1x128xf32>
    %18 = vector.broadcast %17 : vector<1x128xf32> to vector<8x128xf32>
    %19 = arith.addf %16, %18 : vector<8x128xf32>
    %cst_17 = arith.constant 0.000000e+00 : f32
    %20 = vector.broadcast %cst_17 : f32 to vector<8x128xf32>
    %21 = arith.maximumf %19, %20 : vector<8x128xf32>
    %c0_18 = arith.constant 0 : index
    %c0_19 = arith.constant 0 : index
    %22 = vector.load %arg8[%c0_18, %c0_19] : memref<1x128xf32, #tpu.memory_space<vmem>>, vector<1x128xf32>
    %23 = vector.broadcast %22 : vector<1x128xf32> to vector<8x128xf32>
    %24 = arith.addf %21, %23 : vector<8x128xf32>
    %cst_20 = arith.constant dense<0xFF800000> : vector<8xf32>
    %25 = vector.multi_reduction <maximumf>, %24, %cst_20 [1] : vector<8x128xf32> to vector<8xf32>
    %26 = vector.shape_cast %25 : vector<8xf32> to vector<8x1xf32>
    %27 = vector.broadcast %26 : vector<8x1xf32> to vector<8x128xf32>
    %28 = arith.subf %24, %27 : vector<8x128xf32>
    %29 = math.exp %28 : vector<8x128xf32>
    %cst_21 = arith.constant dense<0.000000e+00> : vector<8xf32>
    %30 = vector.multi_reduction <add>, %29, %cst_21 [1] : vector<8x128xf32> to vector<8xf32>
    %31 = vector.shape_cast %30 : vector<8xf32> to vector<8x1xf32>
    %32 = vector.broadcast %31 : vector<8x1xf32> to vector<8x128xf32>
    %33 = arith.divf %29, %32 : vector<8x128xf32>
    %c0_22 = arith.constant 0 : index
    %c0_23 = arith.constant 0 : index
    %34 = vector.load %arg9[%c0_22, %c0_23] : memref<8x128xf32, #tpu.memory_space<vmem>>, vector<8x128xf32>
    tpu.vector_store %arg9[%c0_22, %c0_23], %33 {strides = array<i32>} : memref<8x128xf32, #tpu.memory_space<vmem>>, vector<8x128xf32>,
    return
  }
  func.func @transform_0(%arg0: i32) -> (i32, i32) {
    %c0_i32 = arith.constant 0 : i32
    %c0_i32_0 = arith.constant 0 : i32
    return %arg0, %c0_i32 : i32, i32
  }
  func.func @transform_1(%arg0: i32) -> (i32, i32) {
    %c0_i32 = arith.constant 0 : i32
    %c0_i32_0 = arith.constant 0 : i32
    %c0_i32_1 = arith.constant 0 : i32
    return %c0_i32, %c0_i32_0 : i32, i32
  }
  func.func @transform_2(%arg0: i32) -> (i32, i32) {
    %c0_i32 = arith.constant 0 : i32
    %c0_i32_0 = arith.constant 0 : i32
    %c0_i32_1 = arith.constant 0 : i32
    return %c0_i32, %c0_i32_0 : i32, i32
  }
  func.func @transform_3(%arg0: i32) -> (i32, i32) {
    %c0_i32 = arith.constant 0 : i32
    %c0_i32_0 = arith.constant 0 : i32
    %c0_i32_1 = arith.constant 0 : i32
    return %c0_i32, %c0_i32_0 : i32, i32
  }
  func.func @transform_4(%arg0: i32) -> (i32, i32) {
    %c0_i32 = arith.constant 0 : i32
    %c0_i32_0 = arith.constant 0 : i32
    %c0_i32_1 = arith.constant 0 : i32
    return %c0_i32, %c0_i32_0 : i32, i32
  }
  func.func @transform_5(%arg0: i32) -> (i32, i32) {
    %c0_i32 = arith.constant 0 : i32
    %c0_i32_0 = arith.constant 0 : i32
    %c0_i32_1 = arith.constant 0 : i32
    return %c0_i32, %c0_i32_0 : i32, i32
  }
  func.func @transform_6(%arg0: i32) -> (i32, i32) {
    %c0_i32 = arith.constant 0 : i32
    %c0_i32_0 = arith.constant 0 : i32
    %c0_i32_1 = arith.constant 0 : i32
    return %c0_i32, %c0_i32_0 : i32, i32
  }
  func.func @transform_7(%arg0: i32) -> (i32, i32) {
    %c0_i32 = arith.constant 0 : i32
    %c0_i32_0 = arith.constant 0 : i32
    %c0_i32_1 = arith.constant 0 : i32
    return %c0_i32, %c0_i32_0 : i32, i32
  }
  func.func @transform_8(%arg0: i32) -> (i32, i32) {
    %c0_i32 = arith.constant 0 : i32
    %c0_i32_0 = arith.constant 0 : i32
    return %arg0, %c0_i32 : i32, i32
  }
}

</mosaic_0001>

<bundles_post_ra>
// kernel: tpu_custom_call.1
= control target key start
LH: loop header
LB: loop body
LE: loop exit
PB: predicated region body
PF: predicated region fallthrough
CT: control target
= control target key end

     0   :  { %13 = vsyncpa [#allocation3], 0  ;;  %s709_s0 = inlined_call_operand.hbm [shape: f32[8,16], index: 0, kind: input, shape index: {}]   ;;  %s710_s1 = inlined_call_operand.hbm [shape: f32[16,32], index: 1, kind: input, shape index: {}]   ;;  %s711_s2 = inlined_call_operand.vmem [shape: f32[1,32], index: 2, kind: input, shape index: {}]   ;;  %s712_s3 = inlined_call_operand.hbm [shape: f32[32,32], index: 3, kind: input, shape index: {}]   ;;  %s713_s4 = inlined_call_operand.vmem [shape: f32[1,32], index: 4, kind: input, shape index: {}]   ;;  %s714_s5 = inlined_call_operand.hbm [shape: f32[32,128], index: 5, kind: input, shape index: {}]   ;;  %s715_s6 = inlined_call_operand.vmem [shape: f32[1,128], index: 6, kind: input, shape index: {}]   ;;  %s716_s7 = inlined_call_operand.vmem [shape: f32[1,128], index: 7, kind: input, shape index: {}]   ;;  %s717_s8 = inlined_call_operand.hbm [shape: f32[8,128], index: 8, kind: output, shape index: {}]  }
   0x1   :  { %14 = vsyncpa [#allocation6], 0 }
   0x2   :  { %15 = vsyncpa [#allocation9], 0 }
   0x3   :  { %16 = vsyncpa [#allocation4], 0  ;;  %s570_s27 = smov [#allocation5]   ;;  %s452_s9 = scalar_lea.hbm %s710_s1, 256 }
   0x4   :  { %s32_s28 = sshll.u32 %s570_s27, 4  ;;  %p453_p0 = scmp.ne.s32.totalorder %s710_s1, %s452_s9  ;;  %s33_s28 = int_to_ptr.vmem [resolvable:$true] %s32_s28 }
   0x5   :  { %p456_p1 = scmp.lt.u32.totalorder %s452_s9, %s710_s1 }
   0x7   :  { %p458_p2 = pnand %p456_p1, %p453_p0 }
   0x9   :  { %461 = shalt.err (!%p458_p2)
}
   0xa   :  { %s462_s14 = scalar_lea.vmem %s33_s28, 256  ;;  %p467_p4 = scmp.lt.s32.totalorder %s33_s28, %s33_s28 }
   0xb   :  { %p463_p3 = scmp.ne.s32.totalorder %s33_s28, %s462_s14  ;;  %p468_p5 = scmp.lt.s32.totalorder %s462_s14, %s462_s14 }
   0xd   :  { %p469_p6 = por %p468_p5, %p467_p4 }
   0xf   :  { %p470_p7 = pnand %p469_p6, %p463_p3 }
  0x11   :  { %473 = shalt.err (!%p470_p7)
}
  0x12   :  { %s571_s15 = smov 128   ;;  %s572_s16 = smov 8  }
  0x13   :  { %38 = dma.hbm_to_vmem [thread:$0]  %s710_s1, 256, %s33_s28, [#allocation6], %s571_s15, %s571_s15, %s572_s16  }
  0x14   :  { %s573_s19 = smov [#allocation2]   ;;  %s574_s21 = smov [#allocation7]  }
  0x15   :  { %s23_s20 = sshll.u32 %s573_s19, 4  ;;  %s46_s22 = sshll.u32 %s574_s21, 4  ;;  %s24_s20 = int_to_ptr.vmem [resolvable:$true] %s23_s20  ;;  %s47_s22 = int_to_ptr.vmem [resolvable:$true] %s46_s22 }
  0x16   :  { %s474_s25 = scalar_lea.hbm %s709_s0, 128 }
  0x17   :  { %p475_p8 = scmp.ne.s32.totalorder %s709_s0, %s474_s25  ;;  %p478_p9 = scmp.lt.u32.totalorder %s474_s25, %s709_s0 }
  0x19   :  { %p480_p10 = pnand %p478_p9, %p475_p8 }
  0x1b   :  { %483 = shalt.err (!%p480_p10)
}
  0x1c   :  { %s484_s1 = scalar_lea.vmem %s24_s20, 128  ;;  %p489_p12 = scmp.lt.s32.totalorder %s24_s20, %s24_s20 }
  0x1d   :  { %p485_p11 = scmp.ne.s32.totalorder %s24_s20, %s484_s1  ;;  %p490_p13 = scmp.lt.s32.totalorder %s484_s1, %s484_s1 }
  0x1f   :  { %p491_p0 = por %p490_p13, %p489_p12 }
  0x21   :  { %p492_p1 = pnand %p491_p0, %p485_p11 }
  0x23   :  { %495 = shalt.err (!%p492_p1)
}
  0x24   :  { %26 = dma.hbm_to_vmem [thread:$0]  %s709_s0, 128, %s24_s20, [#allocation3]  }
  0x25   :  { %s496_s12 = scalar_lea.hbm %s712_s3, 512 }
  0x26   :  { %p497_p2 = scmp.ne.s32.totalorder %s712_s3, %s496_s12  ;;  %p500_p3 = scmp.lt.u32.totalorder %s496_s12, %s712_s3 }
  0x28   :  { %p502_p4 = pnand %p500_p3, %p497_p2 }
  0x2a   :  { %505 = shalt.err (!%p502_p4)
}
  0x2b   :  { %s506_s19 = scalar_lea.vmem %s47_s22, 512  ;;  %p511_p6 = scmp.lt.s32.totalorder %s47_s22, %s47_s22 }
  0x2c   :  { %p507_p5 = scmp.ne.s32.totalorder %s47_s22, %s506_s19  ;;  %p512_p7 = scmp.lt.s32.totalorder %s506_s19, %s506_s19 }
  0x2e   :  { %p513_p8 = por %p512_p7, %p511_p6 }
  0x30   :  { %p514_p9 = pnand %p513_p8, %p507_p5 }
  0x32   :  { %517 = shalt.err (!%p514_p9)
}
  0x33   :  { %52 = dma.hbm_to_vmem [thread:$0]  %s712_s3, 512, %s47_s22, [#allocation6], %s571_s15, %s571_s15, %s572_s16  }
  0x34   :  { %s575_s21 = smov [#allocation8]   ;;  %s518_s26 = scalar_lea.hbm %s714_s5, 512 }
  0x35   :  { %s60_s23 = sshll.u32 %s575_s21, 4  ;;  %p519_p10 = scmp.ne.s32.totalorder %s714_s5, %s518_s26  ;;  %s61_s23 = int_to_ptr.vmem [resolvable:$true] %s60_s23 }
  0x36   :  { %p522_p11 = scmp.lt.u32.totalorder %s518_s26, %s714_s5 }
  0x38   :  { %p524_p12 = pnand %p522_p11, %p519_p10 }
  0x3a   :  { %527 = shalt.err (!%p524_p12)
}
  0x3b   :  { %s528_s28 = scalar_lea.vmem %s61_s23, 512  ;;  %p533_p0 = scmp.lt.s32.totalorder %s61_s23, %s61_s23 }
  0x3c   :  { %p529_p13 = scmp.ne.s32.totalorder %s61_s23, %s528_s28  ;;  %p534_p1 = scmp.lt.s32.totalorder %s528_s28, %s528_s28 }
  0x3e   :  { %p535_p2 = por %p534_p1, %p533_p0 }
  0x40   :  { %p536_p3 = pnand %p535_p2, %p529_p13 }
  0x42   :  { %539 = shalt.err (!%p536_p3)
}
  0x43   :  { %66 = dma.hbm_to_vmem [thread:$0]  %s714_s5, 512, %s61_s23, [#allocation9], %s571_s15, %s571_s15, %s572_s16  }
  0x44   :  { %562 = dma.done.wait [#allocation3], 128  }
  0x45   :  { %563 = vsyncadd [#allocation3], 4294967168 }
  0x46   :  { %564 = dma.done.wait [#allocation6], 768  }
  0x47   :  { %565 = vsyncadd [#allocation6], 4294966528 }
  0x48   :  { %566 = dma.done.wait [#allocation9], 512  }
  0x49   :  { %567 = vsyncadd [#allocation9], 4294966784  ;;  %v576_v0 = vmov 0.0|0.0   ;;  %vm577_vm0 = vmmov 0   ;;  %v578_v1 = vmov 0.0   ;;  %v84_v2 = vld [vmem:[#allocation5] sm:$0xff] }
  0x4a   :  { %423 = vmatprep.subr.bf16.mxu0 %v576_v0  ;;  %398 = vmatprep.mubr.msk.f32.mxu0 %vm577_vm0, %v578_v1  ;;  %v85_v3 = vld [vmem:[#allocation5 + $0x8] sm:$0xff]  ;;  %v168_v5 = vld [vmem:[#allocation7] sm:$0xff]  ;;  %v169_v6 = vld [vmem:[#allocation7 + $0x8] sm:$0xff]  ;;  %vm93_vm1 = vcmask 130048   ;;  %vm179_vm2 = vcmask 261120  }
  0x4b   :  { %426 = vmatprep.subr.bf16.mxu1 %v576_v0  ;;  %409 = vmatprep.mubr.msk.f32.mxu1 %vm577_vm0, %v578_v1  ;;  %v424_v4 = vpack.c.bf16 %v85_v3, %v84_v2  ;;  %v427_v7 = vpack.c.bf16 %v169_v6, %v168_v5  ;;  %v83_v8 = vld [vmem:[#allocation2] sm:$0xff]  ;;  %v170_v9 = vld [vmem:[#allocation7 + $0x10] sm:$0xff]  ;;  %v171_v10 = vld [vmem:[#allocation7 + $0x18] sm:$0xff] }
  0x4c   :  { %v430_v11 = vpack.c.bf16 %v171_v10, %v170_v9  ;;  %v254_v12 = vld [vmem:[#allocation8] sm:$0xff]  ;;  %v255_v13 = vld [vmem:[#allocation8 + $0x8] sm:$0xff]  ;;  %v256_v20 = vld [vmem:[#allocation8 + $0x10] sm:$0xff] }
  0x4d   :  { %425 = vmatpush3.bf16.msra.mxu0 %v424_v4  ;;  %428 = vmatpush3.bf16.msra.mxu1 %v427_v7  ;;  %v433_v14 = vpack.c.bf16 %v255_v13, %v254_v12  ;;  %v374_v15 = vld [vmem:[%s711_s2] ss:$0 sm:$0xff]  ;;  %v257_v21 = vld [vmem:[#allocation8 + $0x18] sm:$0xff] }
  0x4e   :  { %432 = vmatprep.subr.bf16.mxu0 %v576_v0  ;;  %429 = vmatprep.subr.bf16.mxu1 %v576_v0  ;;  %v436_v22 = vpack.c.bf16 %v257_v21, %v256_v20  ;;  %v376_v23 = vld [vmem:[%s713_s4] ss:$0 sm:$0xff]  ;;  %s579_s4 = smov [#allocation10]  }
  0x4f   :  { %v378_v28 = vld [vmem:[%s715_s6] ss:$0 sm:$0xff]  ;;  %s363_s6 = sshll.u32 %s579_s4, 4  ;;  %s364_s6 = int_to_ptr.vmem [resolvable:$true] %s363_s6 }
  0x50   :  { %399 = vmatmul.mubr.msk.f32.vlgmr.msra.gmra.mrb[0].mxu0 %vm93_vm1, %v83_v8  ;;  %v380_v32 = vld [vmem:[%s716_s7] ss:$0 sm:$0xff]  ;;  %s540_s13 = scalar_lea.vmem %s364_s6, 128  ;;  %p545_p5 = scmp.lt.s32.totalorder %s364_s6, %s364_s6 }
  0x51   :  { %420 = vmatprep.mubr.msk.f32.mxu0 %vm577_vm0, %v578_v1  ;;  %431 = vmatpush3.bf16.msra.mxu1 %v430_v11  ;;  %p541_p4 = scmp.ne.s32.totalorder %s364_s6, %s540_s13  ;;  %p546_p6 = scmp.lt.s32.totalorder %s540_s13, %s540_s13 }
  0x52   :  { %434 = vmatpush3.bf16.msra.mxu0 %v433_v14 }
  0x53   :  { %435 = vmatprep.subr.bf16.mxu0 %v576_v0  ;;  %p547_p7 = por %p546_p6, %p545_p5 }
  0x55   :  { %p548_p8 = pnand %p547_p7, %p541_p4 }
  0x56   :  { %437 = vmatpush3.bf16.msra.mxu0 %v436_v22 }
 0x123   :  { %v163_v16 = vpop.f32.mrb[0].mxu0 }
 0x124   :  { %v164_v17 = vadd.f32 %v374_v15, %v163_v16  ;;  %v400_v18 = vpop.f32.mrb[1].mxu0 }
 0x126   :  { %v167_v19 = vmax.f32 %v164_v17, 0.0 }
 0x128   :  { %410 = vmatmul.mubr.msk.f32.vlgmr.msra.gmra.mrb[0].mxu1 %vm179_vm2, %v167_v19 }
 0x1fb   :  { %v249_v24 = vpop.f32.mrb[0].mxu1 }
 0x1fc   :  { %v250_v25 = vadd.f32 %v376_v23, %v249_v24  ;;  %v411_v26 = vpop.f32.mrb[1].mxu1 }
 0x1fe   :  { %v253_v27 = vmax.f32 %v250_v25, 0.0 }
 0x200   :  { %421 = vmatmul.mubr.msk.f32.vlgmr.msra.gmra.mrb[2].mxu0 %vm179_vm2, %v253_v27 }
 0x2d3   :  { %v334_v29 = vpop.f32.mrb[2].mxu0 }
 0x2d4   :  { %v335_v30 = vadd.f32 %v378_v28, %v334_v29  ;;  %v422_v31 = vpop.f32.mrb[3].mxu0 }
 0x2d6   :  { %v338_v33 = vmax.f32 %v335_v30, 0.0 }
 0x2d8   :  { %v346_v34 = vadd.f32 %v380_v32, %v338_v33 }
 0x2da   :  { %347 = vmax.xlane.f32.xlu0 %v346_v34 }
 0x367   :  { %v348_v35 = vpop.xlane.xlu0 %347 }
 0x368   :  { %v349_v36 = vsub.f32 %v346_v34, %v348_v35 }
 0x36a   :  { %v350_v37 = vmul.f32 1.442695, %v349_v36 }
 0x36c   :  { %448 = vpow2.f32 %v350_v37 }
 0x376   :  { %v449_v38 = vpop.eup %448 }
 0x377   :  { %352 = vadd.xlane.f32.xlu0 %v449_v38 }
 0x404   :  { %v353_v39 = vpop.xlane.xlu0 %352 }
 0x405   :  { %450 = vrcp.f32 %v353_v39 }
 0x40f   :  { %v451_v40 = vpop.eup %450 }
 0x410   :  { %v355_v41 = vmul.f32 %v451_v40, %v449_v38 }
 0x412   :  { %356 = vst [vmem:[#allocation10] sm:$0xff] %v355_v41 }
 0x413   :  { %551 = shalt.err (!%p548_p8)
}
 0x414   :  { %s552_s17 = scalar_lea.hbm %s717_s8, 128 }
 0x415   :  { %p553_p9 = scmp.ne.s32.totalorder %s717_s8, %s552_s17  ;;  %p556_p10 = scmp.lt.u32.totalorder %s552_s17, %s717_s8 }
 0x417   :  { %p558_p11 = pnand %p556_p10, %p553_p9 }
 0x419   :  { %561 = shalt.err (!%p558_p11)
}
 0x41a   :  { %366 = dma.vmem_to_hbm [thread:$0]  %s364_s6, 128, %s717_s8, [#allocation4]  }
 0x41b   :  { %568 = dma.done.wait [#allocation4], 128  }
 0x41c   :  { %569 = vsyncadd [#allocation4], 4294967168 }
 0x41d   :  { %370 = vsyncpa [#allocation3], 1 }
 0x41e   :  { %371 = vsyncpa [#allocation6], 1 }
 0x41f   :  { %372 = vsyncpa [#allocation9], 1 }
 0x420   :  { %373 = vsyncpa [#allocation4], 1 }

</bundles_post_ra>
